<compile_context>
chip_gen: v6e
topology: v6e:2x2x1
jax: 0.10.0
libtpu: 0.0.40
codegen_flags: <defaults>
</compile_context>

<pallas_src>
import functools

import jax
import jax.numpy as jnp
from jax.experimental import pallas as pl
from jax.experimental.pallas import tpu as pltpu

BN_EPS = 1e-5   # nn.BatchNorm1d default eps
PAD = 128       # lane width for the class dim (lane-dense output store)


# ---------------- fused kernel ----------------

def _make_fused_kernel(n_hidden):
    """Ref order: x, w_1..w_H (BN folded, bf16), fc_w (adjuster folded, bf16),
    vecs (packed biases, f32), out."""

    def kernel(*refs):
        x_ref = refs[0]
        fc_w_ref = refs[1 + n_hidden]
        vec_ref = refs[2 + n_hidden]
        out_ref = refs[3 + n_hidden]

        vecs = vec_ref[...]                                   # (H+1, 128) f32, one DMA
        h = x_ref[...].astype(jnp.bfloat16)                   # bf16 cast in VMEM (no HBM copy)
        for li in range(n_hidden):
            w = refs[1 + li][...]                             # (K, D) bf16, D unpadded
            d = w.shape[1]
            y = jnp.dot(h, w, preferred_element_type=jnp.float32)   # MXU, f32 accum
            y = y + vecs[li:li + 1, :d]                       # folded BN bias (f32)
            h = jnp.maximum(y, 0.0).astype(jnp.bfloat16)      # stays in vregs
        logits = jnp.dot(h, fc_w_ref[...], preferred_element_type=jnp.float32)  # (TB,128)
        out_ref[...] = logits + vecs[n_hidden:n_hidden + 1, :]  # fc bias + adjuster (folded)

    return kernel


# ---------------- jitted wrapper ----------------

def _pick_batch_tile(bp):
    """bp is the batch rounded up to a multiple of 8.  Prefer 512-row tiles
    (multiple of 256 for the v6e/v7x MXU M dim, ~3.5 MB/step << 32 MiB scoped
    VMEM on v7x incl. double buffering); fall back to the whole batch."""
    for tb in (512, 256, 128):
        if bp >= tb and bp % tb == 0:
            return tb
    return bp


@functools.partial(jax.jit, static_argnames=("n_classes",))
def fused_forward(x_img, hidden_ws, fc_w, vecs, *, n_classes):
    """x_img: (B, 1, 28, 28) f32.  hidden_ws / fc_w / vecs from prepare_params()."""
    B = x_img.shape[0]
    x = x_img.reshape(B, -1)                    # f32 flatten; cast to bf16 inside the kernel
    in_dim = x.shape[1]

    bp = -(-B // 8) * 8                         # sublane-align the batch
    tb = _pick_batch_tile(bp)
    bp = -(-bp // tb) * tb
    if bp != B:
        x = jnp.pad(x, ((0, bp - B), (0, 0)))

    n_hidden = len(hidden_ws)
    in_specs = [pl.BlockSpec((tb, in_dim), lambda i: (i, 0))]          # batch-tiled input
    for w in hidden_ws:                                                # weights: DMA once,
        in_specs.append(pl.BlockSpec(w.shape, lambda i: (0, 0)))       # VMEM-resident
    in_specs.append(pl.BlockSpec(fc_w.shape, lambda i: (0, 0)))
    in_specs.append(pl.BlockSpec(vecs.shape, lambda i: (0, 0)))

    out_pad = pl.pallas_call(
        _make_fused_kernel(n_hidden),
        out_shape=jax.ShapeDtypeStruct((bp, PAD), jnp.float32),        # lane-dense store
        grid=(bp // tb,),
        in_specs=in_specs,
        out_specs=pl.BlockSpec((tb, PAD), lambda i: (i, 0)),
        compiler_params=pltpu.CompilerParams(dimension_semantics=("parallel",)),
    )(x, *hidden_ws, fc_w, vecs)
    return out_pad[:B, :n_classes]              # drop batch/class padding outside the kernel


# ---------------- parameter preparation (one-time) ----------------

def prepare_params(raw, *, tau=0.0, img_num_per_cls=None, training=False,
                   for_training=False, use_additive=True):
    """Fold eval-mode BN into (bf16 weight, f32 bias), fold the LogitAdjuster
    affine into the fc layer, pack all bias vectors into one (H+1, 128) array."""
    n_classes = int(raw["fc_w"].shape[1])

    # LogitAdjuster -> per-class affine (exactly the nn.Module branch structure).
    scale = jnp.ones((n_classes,), jnp.float32)
    shift = jnp.zeros((n_classes,), jnp.float32)
    if tau > 0:
        assert img_num_per_cls is not None, "img_num_per_cls required when tau > 0"
        assert min(img_num_per_cls) > 0, "class counts must be > 0 (log(0) = -inf)"
        counts = jnp.asarray(img_num_per_cls, jnp.float32)
        log_p = jnp.log(counts / counts.sum())
        if use_additive:
            if (not for_training) and (not training):
                shift = -tau * log_p
            elif for_training and training:
                shift = tau * log_p
            # else: identity (matches the nn.Module fall-through to `return x`)
        else:
            scale = jnp.exp(-tau * log_p)

    hidden_ws, bias_rows = [], []
    for (w, gamma, beta, mean, var) in raw["hidden"]:
        inv = gamma * jax.lax.rsqrt(var + BN_EPS)              # (1, D)
        hidden_ws.append((w * inv).astype(jnp.bfloat16))       # (K, D), NO width padding
        b_eff = (beta - mean * inv).astype(jnp.float32)        # (1, D)
        bias_rows.append(jnp.pad(b_eff, ((0, 0), (0, PAD - b_eff.shape[1]))))

    # Fold the adjuster into fc (exact affine composition), then pad class dim to 128.
    fc_w = raw["fc_w"] * scale[None, :]
    fc_b = raw["fc_b"] * scale[None, :] + shift[None, :]
    fc_w = jnp.pad(fc_w, ((0, 0), (0, PAD - n_classes))).astype(jnp.bfloat16)
    fc_b = jnp.pad(fc_b, ((0, 0), (0, PAD - n_classes))).astype(jnp.float32)
    bias_rows.append(fc_b)

    vecs = jnp.concatenate(bias_rows, axis=0)                  # (H+1, 128) f32, one DMA
    return tuple(hidden_ws), fc_w, vecs, n_classes


# ---------------- references (pure JAX / XLA) ----------------

def reference_forward(x_img, raw, *, tau=0.0, img_num_per_cls=None,
                      training=False, for_training=False, use_additive=True):
    """Full-precision f32, unfused, unfolded (PyTorch-style math)."""
    B = x_img.shape[0]
    h = x_img.reshape(B, -1)
    for (w, gamma, beta, mean, var) in raw["hidden"]:
        y = h @ w
        y = (y - mean) / jnp.sqrt(var + BN_EPS) * gamma + beta
        h = jnp.maximum(y, 0.0)
    logits = h @ raw["fc_w"] + raw["fc_b"]
    if tau > 0:
        counts = jnp.asarray(img_num_per_cls, jnp.float32)
        log_p = jnp.log(counts / counts.sum())[None, :]
        if use_additive:
            if (not for_training) and (not training):
                return logits - tau * log_p
            if for_training and training:
                return logits + tau * log_p
            return logits
        return logits * jnp.exp(-tau * log_p)
    return logits


def reference_matched(x_img, hidden_ws, fc_w, vecs, n_classes):
    """Same bf16/fold/pad choices as the kernel, in plain XLA (tight check)."""
    B = x_img.shape[0]
    h = x_img.reshape(B, -1).astype(jnp.bfloat16)
    for i, w in enumerate(hidden_ws):
        y = jnp.dot(h, w, preferred_element_type=jnp.float32) + vecs[i:i + 1, :w.shape[1]]
        h = jnp.maximum(y, 0.0).astype(jnp.bfloat16)
    logits = jnp.dot(h, fc_w, preferred_element_type=jnp.float32) + vecs[-1:, :]
    return logits[:, :n_classes]


# ---------------- raw parameter construction ----------------

def make_raw_params(key, in_dim=28 * 28, feat_d=32, hlayers_n=2, n_classes=10):
    params = {"hidden": []}
    dims = [in_dim] + [feat_d] * hlayers_n
    for i in range(hlayers_n):
        k_w, k_g, k_b, k_m, k_v, key = jax.random.split(key, 6)
        bound = 1.0 / jnp.sqrt(dims[i])
        w = jax.random.uniform(k_w, (dims[i], dims[i + 1]), jnp.float32, -bound, bound)
        gamma = 1.0 + 0.1 * jax.random.normal(k_g, (1, dims[i + 1]), jnp.float32)
        beta = 0.1 * jax.random.normal(k_b, (1, dims[i + 1]), jnp.float32)
        mean = 0.1 * jax.random.normal(k_m, (1, dims[i + 1]), jnp.float32)
        var = jax.random.uniform(k_v, (1, dims[i + 1]), jnp.float32, 0.5, 1.5)
        params["hidden"].append((w, gamma, beta, mean, var))
    k_w, k_b, key = jax.random.split(key, 3)
    bound = 1.0 / jnp.sqrt(feat_d)
    params["fc_w"] = jax.random.uniform(k_w, (feat_d, n_classes), jnp.float32, -bound, bound)
    params["fc_b"] = jax.random.uniform(k_b, (1, n_classes), jnp.float32, -bound, bound)
    return params


if __name__ == "__main__":
    key = jax.random.PRNGKey(0)
    k_x, k_p = jax.random.split(key)

    B, H, FEAT, NCLS = 8, 2, 32, 10
    x = jax.random.normal(k_x, (B, 1, 28, 28), jnp.float32)   # MNIST-shaped NCHW input
    raw = make_raw_params(k_p, in_dim=28 * 28, feat_d=FEAT, hlayers_n=H, n_classes=NCLS)

    # Long-tailed class counts so the LogitAdjuster does non-trivial work.
    counts = [5000, 2997, 1796, 1077, 645, 387, 232, 139, 83, 50]

    configs = [
        dict(tau=0.0, img_num_per_cls=None, use_additive=True),     # identity path
        dict(tau=1.0, img_num_per_cls=counts, use_additive=True),   # additive, eval
        dict(tau=0.7, img_num_per_cls=counts, use_additive=False),  # multiplicative
    ]
    for cfg in configs:
        hidden_ws, fc_w, vecs, n_cls = prepare_params(raw, **cfg)
        out = fused_forward(x, hidden_ws, fc_w, vecs, n_classes=n_cls)
        out = jax.block_until_ready(out)
        assert out.shape == (B, NCLS)

        # Tight check: kernel vs pure-XLA forward with identical precision choices.
        ref_m = reference_matched(x, hidden_ws, fc_w, vecs, n_cls)
        assert jnp.allclose(out, ref_m, atol=2e-3, rtol=2e-3), "mismatch vs matched ref"

        # Loose check: full-f32 PyTorch-style math (bf16 matmul rounding budget).
        ref_f32 = reference_forward(x, raw, **cfg)
        assert jnp.allclose(out, ref_f32, atol=5e-2, rtol=5e-2), "mismatch vs f32 ref"

    print("KERNEL_OK")
</pallas_src>

<mosaic_0001>
module attributes {stable_mosaic.version = 11 : i64} {
  func.func @kernel(%arg0: i32, %arg1: memref<8x784xf32, #tpu.memory_space<vmem>>, %arg2: memref<784x32xbf16, #tpu.memory_space<vmem>>, %arg3: memref<32x32xbf16, #tpu.memory_space<vmem>>, %arg4: memref<32x128xbf16, #tpu.memory_space<vmem>>, %arg5: memref<3x128xf32, #tpu.memory_space<vmem>>, %arg6: memref<8x128xf32, #tpu.memory_space<vmem>>) attributes {dimension_semantics = [#tpu.dimension_semantics<parallel>], iteration_bounds = array<i64: 1>, scalar_prefetch = 0 : i64, scratch_operands = 0 : i64, tpu.core_type = #tpu.core_type<tc>, window_params = [{transform_indices = @transform_0, window_bounds = array<i64: 8, 784>}, {pipeline_mode = #tpu.pipeline_mode<synchronous>, transform_indices = @transform_1, window_bounds = array<i64: 784, 32>}, {pipeline_mode = #tpu.pipeline_mode<synchronous>, transform_indices = @transform_2, window_bounds = array<i64: 32, 32>}, {pipeline_mode = #tpu.pipeline_mode<synchronous>, transform_indices = @transform_3, window_bounds = array<i64: 32, 128>}, {pipeline_mode = #tpu.pipeline_mode<synchronous>, transform_indices = @transform_4, window_bounds = array<i64: 3, 128>}, {transform_indices = @transform_5, window_bounds = array<i64: 8, 128>}]} {
    %c0 = arith.constant 0 : index
    %c0_0 = arith.constant 0 : index
    %0 = vector.load %arg5[%c0, %c0_0] : memref<3x128xf32, #tpu.memory_space<vmem>>, vector<3x128xf32>
    %c0_1 = arith.constant 0 : index
    %c0_2 = arith.constant 0 : index
    %1 = vector.load %arg1[%c0_1, %c0_2] : memref<8x784xf32, #tpu.memory_space<vmem>>, vector<8x784xf32>
    %2 = arith.truncf %1 : vector<8x784xf32> to vector<8x784xbf16>
    %c0_3 = arith.constant 0 : index
    %c0_4 = arith.constant 0 : index
    %3 = vector.load %arg2[%c0_3, %c0_4] : memref<784x32xbf16, #tpu.memory_space<vmem>>, vector<784x32xbf16>
    %cst = arith.constant dense<0.000000e+00> : vector<8x32xf32>
    %4 = tpu.matmul %2, %3, %cst {dimension_numbers = #tpu.dot_dimension_numbers<[1], [0], [0], [1], [0, 0, 1, 1], [], []>} : vector<8x784xbf16>, vector<784x32xbf16>, vector<8x32xf32> -> vector<8x32xf32>
    %5 = vector.extract_strided_slice %0 {offsets = [0, 0], sizes = [1, 32], strides = [1, 1]} : vector<3x128xf32> to vector<1x32xf32>
    %6 = vector.broadcast %5 : vector<1x32xf32> to vector<8x32xf32>
    %7 = arith.addf %4, %6 : vector<8x32xf32>
    %cst_5 = arith.constant 0.000000e+00 : f32
    %8 = vector.broadcast %cst_5 : f32 to vector<8x32xf32>
    %9 = arith.maximumf %7, %8 : vector<8x32xf32>
    %10 = arith.truncf %9 : vector<8x32xf32> to vector<8x32xbf16>
    %c0_6 = arith.constant 0 : index
    %c0_7 = arith.constant 0 : index
    %11 = vector.load %arg3[%c0_6, %c0_7] : memref<32x32xbf16, #tpu.memory_space<vmem>>, vector<32x32xbf16>
    %cst_8 = arith.constant dense<0.000000e+00> : vector<8x32xf32>
    %12 = tpu.matmul %10, %11, %cst_8 {dimension_numbers = #tpu.dot_dimension_numbers<[1], [0], [0], [1], [0, 0, 1, 1], [], []>} : vector<8x32xbf16>, vector<32x32xbf16>, vector<8x32xf32> -> vector<8x32xf32>
    %13 = vector.extract_strided_slice %0 {offsets = [1, 0], sizes = [1, 32], strides = [1, 1]} : vector<3x128xf32> to vector<1x32xf32>
    %14 = vector.broadcast %13 : vector<1x32xf32> to vector<8x32xf32>
    %15 = arith.addf %12, %14 : vector<8x32xf32>
    %cst_9 = arith.constant 0.000000e+00 : f32
    %16 = vector.broadcast %cst_9 : f32 to vector<8x32xf32>
    %17 = arith.maximumf %15, %16 : vector<8x32xf32>
    %18 = arith.truncf %17 : vector<8x32xf32> to vector<8x32xbf16>
    %c0_10 = arith.constant 0 : index
    %c0_11 = arith.constant 0 : index
    %19 = vector.load %arg4[%c0_10, %c0_11] : memref<32x128xbf16, #tpu.memory_space<vmem>>, vector<32x128xbf16>
    %cst_12 = arith.constant dense<0.000000e+00> : vector<8x128xf32>
    %20 = tpu.matmul %18, %19, %cst_12 {dimension_numbers = #tpu.dot_dimension_numbers<[1], [0], [0], [1], [0, 0, 1, 1], [], []>} : vector<8x32xbf16>, vector<32x128xbf16>, vector<8x128xf32> -> vector<8x128xf32>
    %21 = vector.extract_strided_slice %0 {offsets = [2, 0], sizes = [1, 128], strides = [1, 1]} : vector<3x128xf32> to vector<1x128xf32>
    %22 = vector.broadcast %21 : vector<1x128xf32> to vector<8x128xf32>
    %23 = arith.addf %20, %22 : vector<8x128xf32>
    %c0_13 = arith.constant 0 : index
    %c0_14 = arith.constant 0 : index
    %24 = vector.load %arg6[%c0_13, %c0_14] : memref<8x128xf32, #tpu.memory_space<vmem>>, vector<8x128xf32>
    tpu.vector_store %arg6[%c0_13, %c0_14], %23 {strides = array<i32>} : memref<8x128xf32, #tpu.memory_space<vmem>>, vector<8x128xf32>,
    return
  }
  func.func @transform_0(%arg0: i32) -> (i32, i32) {
    %c0_i32 = arith.constant 0 : i32
    %c0_i32_0 = arith.constant 0 : i32
    return %arg0, %c0_i32 : i32, i32
  }
  func.func @transform_1(%arg0: i32) -> (i32, i32) {
    %c0_i32 = arith.constant 0 : i32
    %c0_i32_0 = arith.constant 0 : i32
    %c0_i32_1 = arith.constant 0 : i32
    return %c0_i32, %c0_i32_0 : i32, i32
  }
  func.func @transform_2(%arg0: i32) -> (i32, i32) {
    %c0_i32 = arith.constant 0 : i32
    %c0_i32_0 = arith.constant 0 : i32
    %c0_i32_1 = arith.constant 0 : i32
    return %c0_i32, %c0_i32_0 : i32, i32
  }
  func.func @transform_3(%arg0: i32) -> (i32, i32) {
    %c0_i32 = arith.constant 0 : i32
    %c0_i32_0 = arith.constant 0 : i32
    %c0_i32_1 = arith.constant 0 : i32
    return %c0_i32, %c0_i32_0 : i32, i32
  }
  func.func @transform_4(%arg0: i32) -> (i32, i32) {
    %c0_i32 = arith.constant 0 : i32
    %c0_i32_0 = arith.constant 0 : i32
    %c0_i32_1 = arith.constant 0 : i32
    return %c0_i32, %c0_i32_0 : i32, i32
  }
  func.func @transform_5(%arg0: i32) -> (i32, i32) {
    %c0_i32 = arith.constant 0 : i32
    %c0_i32_0 = arith.constant 0 : i32
    return %arg0, %c0_i32 : i32, i32
  }
}

</mosaic_0001>

<bundles_post_ra>
// kernel: fused_forward.1
= control target key start
LH: loop header
LB: loop body
LE: loop exit
PB: predicated region body
PF: predicated region fallthrough
CT: control target
= control target key end

     0   :  { %v973_v44 = vmov 0.0   ;;  %vm974_vm0 = vmmov 0   ;;  %vm433_vm1 = vcmask 130048   ;;  %s1205_s0 = inlined_call_operand.vmem [shape: f32[8,784], index: 0, kind: input, shape index: {}]   ;;  %s1206_s1 = inlined_call_operand.vmem [shape: bf16[784,32], index: 1, kind: input, shape index: {}]   ;;  %s1207_s2 = inlined_call_operand.vmem [shape: bf16[32,32], index: 2, kind: input, shape index: {}]   ;;  %s1208_s3 = inlined_call_operand.vmem [shape: bf16[32,128], index: 3, kind: input, shape index: {}]   ;;  %s1209_s4 = inlined_call_operand.vmem [shape: f32[3,128], index: 4, kind: input, shape index: {}]   ;;  %s1210_s5 = inlined_call_operand.hbm [shape: f32[8,128], index: 5, kind: output, shape index: {}]  }
   0x1   :  { %v898_v0 = vld [vmem:[%s1206_s1 + $0x78] sm:$0xff]   ;;  %v902_v4 = vld [vmem:[%s1206_s1 + $0x70] sm:$0xff]   ;;  %v906_v8 = vld [vmem:[%s1206_s1 + $0x68] sm:$0xff]  }
   0x2   :  { %v899_v1 = vld [vmem:[%s1206_s1 + $0x38] sm:$0xff]   ;;  %799 = vmatprep.subr.bf16.mxu0 %v898_v0  ;;  %v903_v5 = vld [vmem:[%s1206_s1 + $0x30] sm:$0xff]   ;;  %v907_v9 = vld [vmem:[%s1206_s1 + $0x28] sm:$0xff]  }
   0x3   :  { %v900_v2 = vld [vmem:[%s1206_s1 + $0xf8] sm:$0xff]   ;;  %800 = vmatpush3.bf16.msra.mxu0 %v899_v1  ;;  %v904_v6 = vld [vmem:[%s1206_s1 + $0xf0] sm:$0xff]   ;;  %v908_v10 = vld [vmem:[%s1206_s1 + $0xe8] sm:$0xff]  }
   0x4   :  { %v901_v3 = vld [vmem:[%s1206_s1 + $0xb8] sm:$0xff]   ;;  %821 = vmatprep.subr.bf16.mxu1 %v900_v2  ;;  %801 = vmatprep.subr.bf16.mxu0 %v902_v4  ;;  %v905_v7 = vld [vmem:[%s1206_s1 + $0xb0] sm:$0xff]   ;;  %v909_v11 = vld [vmem:[%s1206_s1 + $0xa8] sm:$0xff]  }
   0x5   :  { %822 = vmatpush3.bf16.msra.mxu1 %v901_v3  ;;  %v910_v12 = vld [vmem:[%s1206_s1 + $0x60] sm:$0xff]   ;;  %v914_v16 = vld [vmem:[%s1206_s1 + $0x58] sm:$0xff]   ;;  %v918_v20 = vld [vmem:[%s1206_s1 + $0x50] sm:$0xff]  }
   0x6   :  { %823 = vmatprep.subr.bf16.mxu1 %v904_v6  ;;  %v911_v13 = vld [vmem:[%s1206_s1 + $0x20] sm:$0xff]   ;;  %v915_v17 = vld [vmem:[%s1206_s1 + $0x18] sm:$0xff]   ;;  %v919_v21 = vld [vmem:[%s1206_s1 + $0x10] sm:$0xff]  }
   0x7   :  { %802 = vmatpush3.bf16.msra.mxu0 %v903_v5  ;;  %v912_v14 = vld [vmem:[%s1206_s1 + $0xe0] sm:$0xff]   ;;  %v916_v18 = vld [vmem:[%s1206_s1 + $0xd8] sm:$0xff]   ;;  %v920_v22 = vld [vmem:[%s1206_s1 + $0xd0] sm:$0xff]  }
   0x8   :  { %803 = vmatprep.subr.bf16.mxu0 %v906_v8  ;;  %v913_v15 = vld [vmem:[%s1206_s1 + $0xa0] sm:$0xff]   ;;  %v917_v19 = vld [vmem:[%s1206_s1 + $0x98] sm:$0xff]   ;;  %v921_v23 = vld [vmem:[%s1206_s1 + $0x90] sm:$0xff]  }
   0x9   :  { %824 = vmatpush3.bf16.msra.mxu1 %v905_v7  ;;  %v922_v24 = vld [vmem:[%s1206_s1 + $0x48] sm:$0xff]   ;;  %v926_v28 = vld [vmem:[%s1206_s1 + $0x40] sm:$0xff]   ;;  %v930_v36 = vld [vmem:[%s1206_s1 + $0x178] sm:$0xff]  }
   0xa   :  { %825 = vmatprep.subr.bf16.mxu1 %v908_v10  ;;  %v923_v25 = vld [vmem:[%s1206_s1 + $0x8] sm:$0xff]   ;;  %v927_v29 = vld [vmem:[%s1206_s1] sm:$0xff]   ;;  %v26_v37 = vld [vmem:[%s1205_s0 + $0x18] sm:$0xff] }
   0xb   :  { %804 = vmatpush3.bf16.msra.mxu0 %v907_v9  ;;  %v924_v26 = vld [vmem:[%s1206_s1 + $0xc8] sm:$0xff]   ;;  %v928_v30 = vld [vmem:[%s1206_s1 + $0xc0] sm:$0xff]   ;;  %v33_v38 = vpack.c.bf16 %v26_v37, %v26_v37  ;;  %v931_v39 = vld [vmem:[%s1206_s1 + $0x138] sm:$0xff]  }
   0xc   :  { %805 = vmatprep.subr.bf16.mxu0 %v910_v12  ;;  %v925_v27 = vld [vmem:[%s1206_s1 + $0x88] sm:$0xff]   ;;  %v929_v33 = vld [vmem:[%s1206_s1 + $0x80] sm:$0xff]   ;;  %v25_v40 = vld [vmem:[%s1205_s0 + $0x10] sm:$0xff] }
   0xd   :  { %826 = vmatpush3.bf16.msra.mxu1 %v909_v11  ;;  %v24_v31 = vld [vmem:[%s1205_s0 + $0x8] sm:$0xff]  ;;  %v23_v34 = vld [vmem:[%s1205_s0] sm:$0xff]  ;;  %509 = vmatprep.mubr.bf16.mxu1 %v33_v38  ;;  %v32_v41 = vpack.c.bf16 %v25_v40, %v25_v40  ;;  %v932_v42 = vld [vmem:[%s1206_s1 + $0x170] sm:$0xff]  }
   0xe   :  { %827 = vmatprep.subr.bf16.mxu1 %v912_v14  ;;  %v31_v32 = vpack.c.bf16 %v24_v31, %v24_v31  ;;  %v30_v35 = vpack.c.bf16 %v23_v34, %v23_v34  ;;  %v933_v43 = vld [vmem:[%s1206_s1 + $0x130] sm:$0xff]   ;;  %v934_v45 = vld [vmem:[%s1206_s1 + $0x168] sm:$0xff]   ;;  %v936_v47 = vld [vmem:[%s1206_s1 + $0x160] sm:$0xff]  }
   0xf   :  { %806 = vmatpush3.bf16.msra.mxu0 %v911_v13  ;;  %v935_v46 = vld [vmem:[%s1206_s1 + $0x128] sm:$0xff]   ;;  %v937_v48 = vld [vmem:[%s1206_s1 + $0x120] sm:$0xff]   ;;  %v938_v49 = vld [vmem:[%s1206_s1 + $0x158] sm:$0xff]  }
  0x10   :  { %807 = vmatprep.subr.bf16.mxu0 %v914_v16  ;;  %469 = vmatprep.mubr.bf16.mxu0 %v31_v32  ;;  %v939_v50 = vld [vmem:[%s1206_s1 + $0x118] sm:$0xff]   ;;  %v940_v51 = vld [vmem:[%s1206_s1 + $0x150] sm:$0xff]   ;;  %v946_v53 = vld [vmem:[%s1206_s1 + $0x180] sm:$0xff]  }
  0x11   :  { %828 = vmatpush3.bf16.msra.mxu1 %v913_v15  ;;  %v941_v52 = vld [vmem:[%s1206_s1 + $0x110] sm:$0xff]   ;;  %v28_v54 = vld [vmem:[%s1205_s0 + $0x28] sm:$0xff] }
  0x12   :  { %829 = vmatprep.subr.bf16.mxu1 %v916_v18  ;;  %v942_v55 = vld [vmem:[%s1206_s1 + $0x148] sm:$0xff]   ;;  %v35_v56 = vpack.c.bf16 %v28_v54, %v28_v54  ;;  %v29_v57 = vld [vmem:[%s1205_s0 + $0x30] sm:$0xff] }
  0x13   :  { %808 = vmatpush3.bf16.msra.mxu0 %v915_v17  ;;  %v36_v58 = vpack.c.bf16 %v29_v57, %v29_v57 }
  0x14   :  { %809 = vmatprep.subr.bf16.mxu0 %v918_v20 }
  0x15   :  { %830 = vmatpush3.bf16.msra.mxu1 %v917_v19 }
  0x16   :  { %831 = vmatprep.subr.bf16.mxu1 %v920_v22 }
  0x17   :  { %810 = vmatpush3.bf16.msra.mxu0 %v919_v21 }
  0x18   :  { %811 = vmatprep.subr.bf16.mxu0 %v922_v24 }
  0x19   :  { %832 = vmatpush3.bf16.msra.mxu1 %v921_v23 }
  0x1a   :  { %833 = vmatprep.subr.bf16.mxu1 %v924_v26 }
  0x1b   :  { %812 = vmatpush3.bf16.msra.mxu0 %v923_v25 }
  0x1c   :  { %813 = vmatprep.subr.bf16.mxu0 %v926_v28 }
  0x1d   :  { %834 = vmatpush3.bf16.msra.mxu1 %v925_v27 }
  0x1e   :  { %835 = vmatprep.subr.bf16.mxu1 %v928_v30 }
  0x1f   :  { %814 = vmatpush3.bf16.msra.mxu0 %v927_v29 }
  0x20   :  { %843 = vmatprep.subr.bf16.mxu0 %v930_v36 }
  0x21   :  { %836 = vmatpush3.bf16.msra.mxu1 %v929_v33 }
  0x22   :  { %470 = vmatmul.mubr.bf16.vlgmr.msra.gmra.mxu0 %v30_v35  ;;  %873 = vmatprep.subr.bf16.mxu1 %v973_v44 }
  0x23   :  { %844 = vmatpush3.bf16.msra.mxu0 %v931_v39  ;;  %549 = vmatprep.mubr.bf16.mxu0 %v35_v56 }
  0x24   :  { %510 = vmatmul.mubr.bf16.vlgmr.msra.gmra.mxu1 %v32_v41  ;;  %845 = vmatprep.subr.bf16.mxu0 %v932_v42 }
  0x25   :  { %875 = vmatprep.mubr.msk.bf16.mxu1 %vm974_vm0, %v973_v44  ;;  %874 = vmatpush3.bf16.msra.mxu1 %v946_v53 }
  0x26   :  { %879 = vmatprep.subr.bf16.mxu1 %v973_v44 }
  0x27   :  { %846 = vmatpush3.bf16.msra.mxu0 %v933_v43 }
  0x28   :  { %847 = vmatprep.subr.bf16.mxu0 %v934_v45 }
  0x2b   :  { %848 = vmatpush3.bf16.msra.mxu0 %v935_v46 }
  0x2c   :  { %849 = vmatprep.subr.bf16.mxu0 %v936_v47 }
  0x2f   :  { %850 = vmatpush3.bf16.msra.mxu0 %v937_v48 }
  0x30   :  { %851 = vmatprep.subr.bf16.mxu0 %v938_v49 }
  0x33   :  { %852 = vmatpush3.bf16.msra.mxu0 %v939_v50 }
  0x34   :  { %853 = vmatprep.subr.bf16.mxu0 %v940_v51 }
  0x35   :  { %10 = vsyncpa [#allocation3], 0  ;;  %876 = vmatmul.mubr.msk.bf16.vlgmr.msra.gmra.mxu1 %vm433_vm1, %v36_v58  ;;  %v943_v59 = vld [vmem:[%s1206_s1 + $0x108] sm:$0xff]   ;;  %v944_v60 = vld [vmem:[%s1206_s1 + $0x140] sm:$0xff]   ;;  %v135_v10 = vlaneseq  ;;  %vm619_vm2 = vcmask 261120   ;;  %s975_s11 = smov [#allocation2]  }
  0x36   :  { %883 = vmatprep.mubr.msk.bf16.mxu1 %vm974_vm0, %v973_v44  ;;  %v945_v61 = vld [vmem:[%s1206_s1 + $0x100] sm:$0xff]   ;;  %v947_v0 = vld [vmem:[%s1207_s2 + $0x8] sm:$0xff]   ;;  %s735_s12 = sshll.u32 %s975_s11, 4  ;;  %s736_s12 = int_to_ptr.vmem [resolvable:$true] %s735_s12 }
  0x37   :  { %854 = vmatpush3.bf16.msra.mxu0 %v941_v52  ;;  %v27_v62 = vld [vmem:[%s1205_s0 + $0x20] sm:$0xff]  ;;  %880 = vmatpush3.bf16.msra.mxu1 %v947_v0  ;;  %v136_v11 = vshrl.u32 %v135_v10, 7  ;;  %v949_v31 = vld [vmem:[%s1208_s3 + $0x8] sm:$0xff]   ;;  %p956_p1 = scmp.lt.s32.totalorder %s736_s12, %s736_s12 }
  0x38   :  { %855 = vmatprep.subr.bf16.mxu0 %v942_v55  ;;  %v34_v63 = vpack.c.bf16 %v27_v62, %v27_v62  ;;  %881 = vmatprep.subr.bf16.mxu1 %v973_v44  ;;  %v948_v1 = vld [vmem:[%s1207_s2] sm:$0xff]  }
  0x39   :  { %v137_v14 = vsub.s32 0, %v136_v11  ;;  %v22_v15 = vld [vmem:[%s1209_s4] sm:$0x7]  ;;  %v605_v34 = vsub.s32 1, %v136_v11  ;;  %v671_v43 = vsub.s32 2, %v136_v11 }
  0x3a   :  { %v950_v33 = vld [vmem:[%s1208_s3] sm:$0xff]   ;;  %s951_s3 = scalar_lea.vmem %s736_s12, 128 }
  0x3b   :  { %856 = vmatpush3.bf16.msra.mxu0 %v943_v59  ;;  %882 = vmatpush3.bf16.msra.mxu1 %v948_v1  ;;  %v138_v18 = vrot.slane %v22_v15, %v137_v14  ;;  %v606_v35 = vrot.slane %v22_v15, %v605_v34  ;;  %v672_v45 = vrot.slane %v22_v15, %v671_v43  ;;  %p952_p0 = scmp.ne.s32.totalorder %s736_s12, %s951_s3  ;;  %p957_p2 = scmp.lt.s32.totalorder %s951_s3, %s951_s3 }
  0x3c   :  { %857 = vmatprep.subr.bf16.mxu0 %v944_v60  ;;  %887 = vmatprep.subr.bf16.mxu1 %v973_v44 }
  0x3d   :  { %p958_p3 = por %p957_p2, %p956_p1 }
  0x3f   :  { %858 = vmatpush3.bf16.msra.mxu0 %v945_v61  ;;  %p959_p4 = pnand %p958_p3, %p952_p0 }
  0x42   :  { %550 = vmatmul.mubr.bf16.vlgmr.msra.gmra.mxu0 %v34_v63 }
  0xe2   :  { %v815_v2 = vpop.f32.mrf.mxu0 }
  0xe4   :  { %v816_v3 = vpop.f32.mrf.mxu0  ;;  %v837_v4 = vpop.f32.mrf.mxu1 }
  0xe5   :  { %v817_v19 = vadd.f32 %v816_v3, %v815_v2 }
  0xe6   :  { %v818_v5 = vpop.f32.mrf.mxu0  ;;  %v838_v6 = vpop.f32.mrf.mxu1 }
  0xe7   :  { %v472_v20 = vadd.f32 %v817_v19, %v138_v18  ;;  %v839_v21 = vadd.f32 %v838_v6, %v837_v4 }
  0xe8   :  { %v819_v7 = vpop.f32.mrf.mxu0  ;;  %v840_v8 = vpop.f32.mrf.mxu1 }
  0xe9   :  { %v512_v24 = vadd.f32 %v839_v21, %v472_v20 }
  0xea   :  { %v841_v9 = vpop.f32.mrf.mxu1 }
  0xf5   :  { %v591_v12 = vpop.f32.mrf.mxu1 }
  0xf7   :  { %v877_v13 = vpop.f32.mrf.mxu1 }
  0xf9   :  { %v594_v16 = vpop.f32.mrf.mxu1 }
  0xfb   :  { %v878_v17 = vpop.f32.mrf.mxu1 }
 0x102   :  { %v859_v22 = vpop.f32.mrf.mxu0 }
 0x104   :  { %v860_v23 = vpop.f32.mrf.mxu0 }
 0x105   :  { %v861_v25 = vadd.f32 %v860_v23, %v859_v22 }
 0x106   :  { %v862_v26 = vpop.f32.mrf.mxu0 }
 0x107   :  { %v552_v27 = vadd.f32 %v861_v25, %v512_v24 }
 0x108   :  { %v863_v28 = vpop.f32.mrf.mxu0 }
 0x109   :  { %v592_v29 = vadd.f32 %v591_v12, %v552_v27 }
 0x10b   :  { %v597_v30 = vmax.f32 %v592_v29, 0.0 }
 0x10d   :  { %v598_v32 = vpack.c.bf16 %v597_v30, %v597_v30 }
 0x10f   :  { %884 = vmatmul.mubr.msk.bf16.vlgmr.msra.gmra.mxu1 %vm619_vm2, %v598_v32 }
 0x110   :  { %888 = vmatpush3.bf16.msra.mxu1 %v949_v31  ;;  %891 = vmatprep.mubr.msk.bf16.mxu1 %vm974_vm0, %v973_v44 }
 0x111   :  { %889 = vmatprep.subr.bf16.mxu1 %v973_v44 }
 0x114   :  { %890 = vmatpush3.bf16.msra.mxu1 %v950_v33 }
 0x1cf   :  { %v657_v36 = vpop.f32.mrf.mxu1 }
 0x1d0   :  { %v658_v37 = vadd.f32 %v657_v36, %v606_v35 }
 0x1d1   :  { %v885_v38 = vpop.f32.mrf.mxu1 }
 0x1d2   :  { %v663_v39 = vmax.f32 %v658_v37, 0.0 }
 0x1d3   :  { %v660_v40 = vpop.f32.mrf.mxu1 }
 0x1d4   :  { %v664_v41 = vpack.c.bf16 %v663_v39, %v663_v39 }
 0x1d5   :  { %v886_v42 = vpop.f32.mrf.mxu1 }
 0x1d6   :  { %892 = vmatmul.mubr.msk.bf16.vlgmr.msra.gmra.mxu1 %vm619_vm2, %v664_v41 }
 0x296   :  { %v722_v44 = vpop.f32.mrf.mxu1 }
 0x297   :  { %v723_v46 = vadd.f32 %v722_v44, %v672_v45 }
 0x298   :  { %v893_v47 = vpop.f32.mrf.mxu1 }
 0x299   :  { %728 = vst [vmem:[#allocation2] sm:$0xff] %v723_v46 }
 0x29a   :  { %v725_v48 = vpop.f32.mrf.mxu1 }
 0x29b   :  { %962 = shalt.err (!%p959_p4)
}
 0x29c   :  { %738 = dma.vmem_to_hbm [thread:$0]  %s736_s12, 128, %s1210_s5, [#allocation3]   ;;  %v894_v49 = vpop.f32.mrf.mxu1 }
 0x29d   :  { %971 = dma.done.wait [#allocation3], 128  }
 0x29e   :  { %972 = vsyncadd [#allocation3], 4294967168 }
 0x29f   :  { %742 = vsyncpa [#allocation3], 1 }

</bundles_post_ra>
